<compile_context>
chip_gen: v7x
topology: tpu7x:2x2x1
jax: 0.10.0
libtpu: 0.0.40
codegen_flags: <defaults>
</compile_context>

<pallas_src>
import functools

import jax
import jax.numpy as jnp
from jax.experimental import pallas as pl
from jax.experimental.pallas import tpu as pltpu


def _sigmoid(z):
    return 1.0 / (1.0 + jnp.exp(-z))


def _make_lstm_kernel(num_layers, hidden_size):
    H = hidden_size

    def kernel(x_ref, *refs):
        # refs = [w_ih0, w_hh0, b0, w_ih1, w_hh1, b1, ..., w_fc, b_fc, o_ref]
        o_ref = refs[-1]
        w_fc_ref, b_fc_ref = refs[-3], refs[-2]
        layer_refs = refs[: 3 * num_layers]

        x = x_ref[...]
        bt = x.shape[0]
        h = jnp.zeros((bt, H), jnp.float32)
        c = jnp.zeros((bt, H), jnp.float32)
        inp = x
        for l in range(num_layers):
            w_ih = layer_refs[3 * l][...]
            w_hh = layer_refs[3 * l + 1][...]
            b = layer_refs[3 * l + 2][...]
            gates = (
                jnp.dot(inp, w_ih, preferred_element_type=jnp.float32)
                + jnp.dot(h, w_hh, preferred_element_type=jnp.float32)
                + b
            )
            i_g = _sigmoid(gates[:, 0 * H : 1 * H])
            f_g = _sigmoid(gates[:, 1 * H : 2 * H])
            g_g = jnp.tanh(gates[:, 2 * H : 3 * H])
            o_g = _sigmoid(gates[:, 3 * H : 4 * H])
            c = f_g * c + i_g * g_g
            h = o_g * jnp.tanh(c)
            inp = h  # nn.Dropout(0.2) -> identity in eval mode

        # Lane-dense (block_b, 128-multiple) store; padded fc columns are zeros.
        o_ref[...] = (
            jnp.dot(h, w_fc_ref[...], preferred_element_type=jnp.float32)
            + b_fc_ref[...]
        )

    return kernel


@functools.partial(jax.jit, static_argnames=("block_b",))
def lstm_model_forward(x, params, *, block_b=512):
    """x: (B, input_size) f32. params: {"layers": [(w_ih, w_hh, b), ...], "w_fc", "b_fc"}."""
    B, input_size = x.shape
    layers = params["layers"]
    num_layers = len(layers)
    hidden_size = layers[0][1].shape[0]
    w_fc, b_fc = params["w_fc"], params["b_fc"]
    output_size = w_fc.shape[1]

    # Batch tiling: large tiles, batch zero-padded up to a multiple of block_b.
    # (On v7x keep block_b <= B_pad // 2 for big batches so both TensorCores get work.)
    block_b = max(8, min(block_b, pl.cdiv(B, 8) * 8))
    B_pad = pl.cdiv(B, block_b) * block_b
    if B_pad != B:
        x = jnp.pad(x, ((0, B_pad - B), (0, 0)))

    # Lane-dense output: pad fc columns to a multiple of 128, slice after the call.
    out_pad = pl.cdiv(output_size, 128) * 128
    w_fc_p = jnp.pad(w_fc, ((0, 0), (0, out_pad - output_size)))
    b_fc_p = jnp.pad(b_fc, ((0, 0), (0, out_pad - output_size)))

    grid = (B_pad // block_b,)
    full = lambda a: pl.BlockSpec(a.shape, lambda i: (0, 0))  # tiny constants, full block

    layer_args, layer_specs = [], []
    for (w_ih, w_hh, b) in layers:
        layer_args += [w_ih, w_hh, b]
        layer_specs += [full(w_ih), full(w_hh), full(b)]

    out = pl.pallas_call(
        _make_lstm_kernel(num_layers, hidden_size),
        out_shape=jax.ShapeDtypeStruct((B_pad, out_pad), jnp.float32),
        grid_spec=pltpu.PrefetchScalarGridSpec(
            num_scalar_prefetch=0,
            grid=grid,
            in_specs=[pl.BlockSpec((block_b, input_size), lambda i: (i, 0))]
            + layer_specs
            + [full(w_fc_p), full(b_fc_p)],
            out_specs=pl.BlockSpec((block_b, out_pad), lambda i: (i, 0)),
        ),
        compiler_params=pltpu.CompilerParams(
            dimension_semantics=("parallel",),
        ),
    )(x, *layer_args, w_fc_p, b_fc_p)

    return out[:B, :output_size]


def init_params(key, input_size, hidden_size, num_layers, output_size):
    """Deterministic init mimicking nn.LSTM / nn.Linear (uniform +/- 1/sqrt(hidden))."""
    layers = []
    bound = 1.0 / jnp.sqrt(float(hidden_size))
    for l in range(num_layers):
        in_dim = input_size if l == 0 else hidden_size
        key, k1, k2, k3, k4 = jax.random.split(key, 5)
        w_ih = jax.random.uniform(k1, (in_dim, 4 * hidden_size), jnp.float32, -bound, bound)
        w_hh = jax.random.uniform(k2, (hidden_size, 4 * hidden_size), jnp.float32, -bound, bound)
        b_ih = jax.random.uniform(k3, (1, 4 * hidden_size), jnp.float32, -bound, bound)
        b_hh = jax.random.uniform(k4, (1, 4 * hidden_size), jnp.float32, -bound, bound)
        layers.append((w_ih, w_hh, b_ih + b_hh))
    key, kw, kb = jax.random.split(key, 3)
    w_fc = jax.random.uniform(kw, (hidden_size, output_size), jnp.float32, -bound, bound)
    b_fc = jax.random.uniform(kb, (1, output_size), jnp.float32, -bound, bound)
    return {"layers": layers, "w_fc": w_fc, "b_fc": b_fc}


def _reference_forward(x, params):
    B = x.shape[0]
    H = params["layers"][0][1].shape[0]
    h = jnp.zeros((B, H), jnp.float32)
    c = jnp.zeros((B, H), jnp.float32)
    inp = x
    for (w_ih, w_hh, b) in params["layers"]:
        gates = inp @ w_ih + h @ w_hh + b
        i_g = _sigmoid(gates[:, 0 * H : 1 * H])
        f_g = _sigmoid(gates[:, 1 * H : 2 * H])
        g_g = jnp.tanh(gates[:, 2 * H : 3 * H])
        o_g = _sigmoid(gates[:, 3 * H : 4 * H])
        c = f_g * c + i_g * g_g
        h = o_g * jnp.tanh(c)
        inp = h
    return h @ params["w_fc"] + params["b_fc"]


if __name__ == "__main__":
    key = jax.random.PRNGKey(0)
    k_params, k_x = jax.random.split(key)

    input_size, hidden_size, num_layers, output_size, batch = 16, 32, 2, 1, 8
    params = init_params(k_params, input_size, hidden_size, num_layers, output_size)
    x = jax.random.normal(k_x, (batch, input_size), dtype=jnp.float32)

    out = lstm_model_forward(x, params, block_b=512)
    out = jax.block_until_ready(out)

    ref = _reference_forward(x, params)
    assert out.shape == (batch, output_size)
    assert jnp.allclose(out, ref, atol=1e-4, rtol=1e-4), "mismatch vs JAX reference"

    print("KERNEL_OK")
</pallas_src>

<mosaic_0001>
module attributes {stable_mosaic.version = 11 : i64} {
  func.func @kernel(%arg0: i32, %arg1: memref<8x16xf32, #tpu.memory_space<vmem>>, %arg2: memref<16x128xf32, #tpu.memory_space<vmem>>, %arg3: memref<32x128xf32, #tpu.memory_space<vmem>>, %arg4: memref<1x128xf32, #tpu.memory_space<vmem>>, %arg5: memref<32x128xf32, #tpu.memory_space<vmem>>, %arg6: memref<32x128xf32, #tpu.memory_space<vmem>>, %arg7: memref<1x128xf32, #tpu.memory_space<vmem>>, %arg8: memref<32x128xf32, #tpu.memory_space<vmem>>, %arg9: memref<1x128xf32, #tpu.memory_space<vmem>>, %arg10: memref<8x128xf32, #tpu.memory_space<vmem>>) attributes {dimension_semantics = [#tpu.dimension_semantics<parallel>], iteration_bounds = array<i64: 1>, scalar_prefetch = 0 : i64, scratch_operands = 0 : i64, tpu.core_type = #tpu.core_type<tc>, window_params = [{transform_indices = @transform_0, window_bounds = array<i64: 8, 16>}, {pipeline_mode = #tpu.pipeline_mode<synchronous>, transform_indices = @transform_1, window_bounds = array<i64: 16, 128>}, {pipeline_mode = #tpu.pipeline_mode<synchronous>, transform_indices = @transform_2, window_bounds = array<i64: 32, 128>}, {pipeline_mode = #tpu.pipeline_mode<synchronous>, transform_indices = @transform_3, window_bounds = array<i64: 1, 128>}, {pipeline_mode = #tpu.pipeline_mode<synchronous>, transform_indices = @transform_4, window_bounds = array<i64: 32, 128>}, {pipeline_mode = #tpu.pipeline_mode<synchronous>, transform_indices = @transform_5, window_bounds = array<i64: 32, 128>}, {pipeline_mode = #tpu.pipeline_mode<synchronous>, transform_indices = @transform_6, window_bounds = array<i64: 1, 128>}, {pipeline_mode = #tpu.pipeline_mode<synchronous>, transform_indices = @transform_7, window_bounds = array<i64: 32, 128>}, {pipeline_mode = #tpu.pipeline_mode<synchronous>, transform_indices = @transform_8, window_bounds = array<i64: 1, 128>}, {transform_indices = @transform_9, window_bounds = array<i64: 8, 128>}]} {
    %c0 = arith.constant 0 : index
    %c0_0 = arith.constant 0 : index
    %0 = vector.load %arg1[%c0, %c0_0] : memref<8x16xf32, #tpu.memory_space<vmem>>, vector<8x16xf32>
    %cst = arith.constant 0.000000e+00 : f32
    %1 = vector.broadcast %cst : f32 to vector<8x32xf32>
    %cst_1 = arith.constant 0.000000e+00 : f32
    %2 = vector.broadcast %cst_1 : f32 to vector<8x32xf32>
    %c0_2 = arith.constant 0 : index
    %c0_3 = arith.constant 0 : index
    %3 = vector.load %arg2[%c0_2, %c0_3] : memref<16x128xf32, #tpu.memory_space<vmem>>, vector<16x128xf32>
    %c0_4 = arith.constant 0 : index
    %c0_5 = arith.constant 0 : index
    %4 = vector.load %arg3[%c0_4, %c0_5] : memref<32x128xf32, #tpu.memory_space<vmem>>, vector<32x128xf32>
    %c0_6 = arith.constant 0 : index
    %c0_7 = arith.constant 0 : index
    %5 = vector.load %arg4[%c0_6, %c0_7] : memref<1x128xf32, #tpu.memory_space<vmem>>, vector<1x128xf32>
    %cst_8 = arith.constant dense<0.000000e+00> : vector<8x128xf32>
    %6 = tpu.matmul %0, %3, %cst_8 {dimension_numbers = #tpu.dot_dimension_numbers<[1], [0], [0], [1], [0, 0, 1, 1], [], []>} : vector<8x16xf32>, vector<16x128xf32>, vector<8x128xf32> -> vector<8x128xf32>
    %cst_9 = arith.constant dense<0.000000e+00> : vector<8x128xf32>
    %7 = tpu.matmul %1, %4, %cst_9 {dimension_numbers = #tpu.dot_dimension_numbers<[1], [0], [0], [1], [0, 0, 1, 1], [], []>} : vector<8x32xf32>, vector<32x128xf32>, vector<8x128xf32> -> vector<8x128xf32>
    %8 = arith.addf %6, %7 : vector<8x128xf32>
    %9 = vector.broadcast %5 : vector<1x128xf32> to vector<8x128xf32>
    %10 = arith.addf %8, %9 : vector<8x128xf32>
    %11 = vector.extract_strided_slice %10 {offsets = [0, 0], sizes = [8, 32], strides = [1, 1]} : vector<8x128xf32> to vector<8x32xf32>
    %cst_10 = arith.constant 0.000000e+00 : f32
    %12 = vector.broadcast %cst_10 : f32 to vector<8x32xf32>
    %13 = arith.subf %12, %11 : vector<8x32xf32>
    %14 = math.exp %13 : vector<8x32xf32>
    %cst_11 = arith.constant 1.000000e+00 : f32
    %15 = vector.broadcast %cst_11 : f32 to vector<8x32xf32>
    %16 = arith.addf %15, %14 : vector<8x32xf32>
    %cst_12 = arith.constant 1.000000e+00 : f32
    %17 = vector.broadcast %cst_12 : f32 to vector<8x32xf32>
    %18 = arith.divf %17, %16 : vector<8x32xf32>
    %19 = vector.extract_strided_slice %10 {offsets = [0, 32], sizes = [8, 32], strides = [1, 1]} : vector<8x128xf32> to vector<8x32xf32>
    %cst_13 = arith.constant 0.000000e+00 : f32
    %20 = vector.broadcast %cst_13 : f32 to vector<8x32xf32>
    %21 = arith.subf %20, %19 : vector<8x32xf32>
    %22 = math.exp %21 : vector<8x32xf32>
    %cst_14 = arith.constant 1.000000e+00 : f32
    %23 = vector.broadcast %cst_14 : f32 to vector<8x32xf32>
    %24 = arith.addf %23, %22 : vector<8x32xf32>
    %cst_15 = arith.constant 1.000000e+00 : f32
    %25 = vector.broadcast %cst_15 : f32 to vector<8x32xf32>
    %26 = arith.divf %25, %24 : vector<8x32xf32>
    %27 = vector.extract_strided_slice %10 {offsets = [0, 64], sizes = [8, 32], strides = [1, 1]} : vector<8x128xf32> to vector<8x32xf32>
    %28 = math.tanh %27 : vector<8x32xf32>
    %29 = vector.extract_strided_slice %10 {offsets = [0, 96], sizes = [8, 32], strides = [1, 1]} : vector<8x128xf32> to vector<8x32xf32>
    %cst_16 = arith.constant 0.000000e+00 : f32
    %30 = vector.broadcast %cst_16 : f32 to vector<8x32xf32>
    %31 = arith.subf %30, %29 : vector<8x32xf32>
    %32 = math.exp %31 : vector<8x32xf32>
    %cst_17 = arith.constant 1.000000e+00 : f32
    %33 = vector.broadcast %cst_17 : f32 to vector<8x32xf32>
    %34 = arith.addf %33, %32 : vector<8x32xf32>
    %cst_18 = arith.constant 1.000000e+00 : f32
    %35 = vector.broadcast %cst_18 : f32 to vector<8x32xf32>
    %36 = arith.divf %35, %34 : vector<8x32xf32>
    %37 = arith.mulf %26, %2 : vector<8x32xf32>
    %38 = arith.mulf %18, %28 : vector<8x32xf32>
    %39 = arith.addf %37, %38 : vector<8x32xf32>
    %40 = math.tanh %39 : vector<8x32xf32>
    %41 = arith.mulf %36, %40 : vector<8x32xf32>
    %c0_19 = arith.constant 0 : index
    %c0_20 = arith.constant 0 : index
    %42 = vector.load %arg5[%c0_19, %c0_20] : memref<32x128xf32, #tpu.memory_space<vmem>>, vector<32x128xf32>
    %c0_21 = arith.constant 0 : index
    %c0_22 = arith.constant 0 : index
    %43 = vector.load %arg6[%c0_21, %c0_22] : memref<32x128xf32, #tpu.memory_space<vmem>>, vector<32x128xf32>
    %c0_23 = arith.constant 0 : index
    %c0_24 = arith.constant 0 : index
    %44 = vector.load %arg7[%c0_23, %c0_24] : memref<1x128xf32, #tpu.memory_space<vmem>>, vector<1x128xf32>
    %cst_25 = arith.constant dense<0.000000e+00> : vector<8x128xf32>
    %45 = tpu.matmul %41, %42, %cst_25 {dimension_numbers = #tpu.dot_dimension_numbers<[1], [0], [0], [1], [0, 0, 1, 1], [], []>} : vector<8x32xf32>, vector<32x128xf32>, vector<8x128xf32> -> vector<8x128xf32>
    %cst_26 = arith.constant dense<0.000000e+00> : vector<8x128xf32>
    %46 = tpu.matmul %41, %43, %cst_26 {dimension_numbers = #tpu.dot_dimension_numbers<[1], [0], [0], [1], [0, 0, 1, 1], [], []>} : vector<8x32xf32>, vector<32x128xf32>, vector<8x128xf32> -> vector<8x128xf32>
    %47 = arith.addf %45, %46 : vector<8x128xf32>
    %48 = vector.broadcast %44 : vector<1x128xf32> to vector<8x128xf32>
    %49 = arith.addf %47, %48 : vector<8x128xf32>
    %50 = vector.extract_strided_slice %49 {offsets = [0, 0], sizes = [8, 32], strides = [1, 1]} : vector<8x128xf32> to vector<8x32xf32>
    %cst_27 = arith.constant 0.000000e+00 : f32
    %51 = vector.broadcast %cst_27 : f32 to vector<8x32xf32>
    %52 = arith.subf %51, %50 : vector<8x32xf32>
    %53 = math.exp %52 : vector<8x32xf32>
    %cst_28 = arith.constant 1.000000e+00 : f32
    %54 = vector.broadcast %cst_28 : f32 to vector<8x32xf32>
    %55 = arith.addf %54, %53 : vector<8x32xf32>
    %cst_29 = arith.constant 1.000000e+00 : f32
    %56 = vector.broadcast %cst_29 : f32 to vector<8x32xf32>
    %57 = arith.divf %56, %55 : vector<8x32xf32>
    %58 = vector.extract_strided_slice %49 {offsets = [0, 32], sizes = [8, 32], strides = [1, 1]} : vector<8x128xf32> to vector<8x32xf32>
    %cst_30 = arith.constant 0.000000e+00 : f32
    %59 = vector.broadcast %cst_30 : f32 to vector<8x32xf32>
    %60 = arith.subf %59, %58 : vector<8x32xf32>
    %61 = math.exp %60 : vector<8x32xf32>
    %cst_31 = arith.constant 1.000000e+00 : f32
    %62 = vector.broadcast %cst_31 : f32 to vector<8x32xf32>
    %63 = arith.addf %62, %61 : vector<8x32xf32>
    %cst_32 = arith.constant 1.000000e+00 : f32
    %64 = vector.broadcast %cst_32 : f32 to vector<8x32xf32>
    %65 = arith.divf %64, %63 : vector<8x32xf32>
    %66 = vector.extract_strided_slice %49 {offsets = [0, 64], sizes = [8, 32], strides = [1, 1]} : vector<8x128xf32> to vector<8x32xf32>
    %67 = math.tanh %66 : vector<8x32xf32>
    %68 = vector.extract_strided_slice %49 {offsets = [0, 96], sizes = [8, 32], strides = [1, 1]} : vector<8x128xf32> to vector<8x32xf32>
    %cst_33 = arith.constant 0.000000e+00 : f32
    %69 = vector.broadcast %cst_33 : f32 to vector<8x32xf32>
    %70 = arith.subf %69, %68 : vector<8x32xf32>
    %71 = math.exp %70 : vector<8x32xf32>
    %cst_34 = arith.constant 1.000000e+00 : f32
    %72 = vector.broadcast %cst_34 : f32 to vector<8x32xf32>
    %73 = arith.addf %72, %71 : vector<8x32xf32>
    %cst_35 = arith.constant 1.000000e+00 : f32
    %74 = vector.broadcast %cst_35 : f32 to vector<8x32xf32>
    %75 = arith.divf %74, %73 : vector<8x32xf32>
    %76 = arith.mulf %65, %39 : vector<8x32xf32>
    %77 = arith.mulf %57, %67 : vector<8x32xf32>
    %78 = arith.addf %76, %77 : vector<8x32xf32>
    %79 = math.tanh %78 : vector<8x32xf32>
    %80 = arith.mulf %75, %79 : vector<8x32xf32>
    %c0_36 = arith.constant 0 : index
    %c0_37 = arith.constant 0 : index
    %81 = vector.load %arg8[%c0_36, %c0_37] : memref<32x128xf32, #tpu.memory_space<vmem>>, vector<32x128xf32>
    %cst_38 = arith.constant dense<0.000000e+00> : vector<8x128xf32>
    %82 = tpu.matmul %80, %81, %cst_38 {dimension_numbers = #tpu.dot_dimension_numbers<[1], [0], [0], [1], [0, 0, 1, 1], [], []>} : vector<8x32xf32>, vector<32x128xf32>, vector<8x128xf32> -> vector<8x128xf32>
    %c0_39 = arith.constant 0 : index
    %c0_40 = arith.constant 0 : index
    %83 = vector.load %arg9[%c0_39, %c0_40] : memref<1x128xf32, #tpu.memory_space<vmem>>, vector<1x128xf32>
    %84 = vector.broadcast %83 : vector<1x128xf32> to vector<8x128xf32>
    %85 = arith.addf %82, %84 : vector<8x128xf32>
    %c0_41 = arith.constant 0 : index
    %c0_42 = arith.constant 0 : index
    %86 = vector.load %arg10[%c0_41, %c0_42] : memref<8x128xf32, #tpu.memory_space<vmem>>, vector<8x128xf32>
    tpu.vector_store %arg10[%c0_41, %c0_42], %85 {strides = array<i32>} : memref<8x128xf32, #tpu.memory_space<vmem>>, vector<8x128xf32>,
    return
  }
  func.func @transform_0(%arg0: i32) -> (i32, i32) {
    %c0_i32 = arith.constant 0 : i32
    %c0_i32_0 = arith.constant 0 : i32
    return %arg0, %c0_i32 : i32, i32
  }
  func.func @transform_1(%arg0: i32) -> (i32, i32) {
    %c0_i32 = arith.constant 0 : i32
    %c0_i32_0 = arith.constant 0 : i32
    %c0_i32_1 = arith.constant 0 : i32
    return %c0_i32, %c0_i32_0 : i32, i32
  }
  func.func @transform_2(%arg0: i32) -> (i32, i32) {
    %c0_i32 = arith.constant 0 : i32
    %c0_i32_0 = arith.constant 0 : i32
    %c0_i32_1 = arith.constant 0 : i32
    return %c0_i32, %c0_i32_0 : i32, i32
  }
  func.func @transform_3(%arg0: i32) -> (i32, i32) {
    %c0_i32 = arith.constant 0 : i32
    %c0_i32_0 = arith.constant 0 : i32
    %c0_i32_1 = arith.constant 0 : i32
    return %c0_i32, %c0_i32_0 : i32, i32
  }
  func.func @transform_4(%arg0: i32) -> (i32, i32) {
    %c0_i32 = arith.constant 0 : i32
    %c0_i32_0 = arith.constant 0 : i32
    %c0_i32_1 = arith.constant 0 : i32
    return %c0_i32, %c0_i32_0 : i32, i32
  }
  func.func @transform_5(%arg0: i32) -> (i32, i32) {
    %c0_i32 = arith.constant 0 : i32
    %c0_i32_0 = arith.constant 0 : i32
    %c0_i32_1 = arith.constant 0 : i32
    return %c0_i32, %c0_i32_0 : i32, i32
  }
  func.func @transform_6(%arg0: i32) -> (i32, i32) {
    %c0_i32 = arith.constant 0 : i32
    %c0_i32_0 = arith.constant 0 : i32
    %c0_i32_1 = arith.constant 0 : i32
    return %c0_i32, %c0_i32_0 : i32, i32
  }
  func.func @transform_7(%arg0: i32) -> (i32, i32) {
    %c0_i32 = arith.constant 0 : i32
    %c0_i32_0 = arith.constant 0 : i32
    %c0_i32_1 = arith.constant 0 : i32
    return %c0_i32, %c0_i32_0 : i32, i32
  }
  func.func @transform_8(%arg0: i32) -> (i32, i32) {
    %c0_i32 = arith.constant 0 : i32
    %c0_i32_0 = arith.constant 0 : i32
    %c0_i32_1 = arith.constant 0 : i32
    return %c0_i32, %c0_i32_0 : i32, i32
  }
  func.func @transform_9(%arg0: i32) -> (i32, i32) {
    %c0_i32 = arith.constant 0 : i32
    %c0_i32_0 = arith.constant 0 : i32
    return %arg0, %c0_i32 : i32, i32
  }
}

</mosaic_0001>

<bundles_post_ra>
// kernel: lstm_model_forward.1
= control target key start
LH: loop header
LB: loop body
LE: loop exit
PB: predicated region body
PF: predicated region fallthrough
CT: control target
= control target key end

     0   :  { %14 = vsyncpa [#allocation3], 0  ;;  %s875_s0 = inlined_call_operand.hbm [shape: f32[8,16], index: 0, kind: input, shape index: {}]   ;;  %s876_s1 = inlined_call_operand.vmem [shape: f32[16,128], index: 1, kind: input, shape index: {}]   ;;  %s877_s2 = inlined_call_operand.vmem [shape: f32[32,128], index: 2, kind: input, shape index: {}]   ;;  %s878_s3 = inlined_call_operand.vmem [shape: f32[1,128], index: 3, kind: input, shape index: {}]   ;;  %s879_s4 = inlined_call_operand.vmem [shape: f32[32,128], index: 4, kind: input, shape index: {}]   ;;  %s880_s5 = inlined_call_operand.vmem [shape: f32[32,128], index: 5, kind: input, shape index: {}]   ;;  %s881_s6 = inlined_call_operand.hbm [shape: f32[1,128], index: 6, kind: input, shape index: {}]   ;;  %s882_s7 = inlined_call_operand.vmem [shape: f32[32,128], index: 7, kind: input, shape index: {}]   ;;  %s883_s8 = inlined_call_operand.vmem [shape: f32[1,128], index: 8, kind: input, shape index: {}]   ;;  %s884_s9 = inlined_call_operand.vmem [shape: f32[8,128], index: 9, kind: output, shape index: {}]  }
   0x1   :  { %15 = vsyncpa [#allocation5], 0  ;;  %s700_s30 = smov [#allocation2]   ;;  %s701_s11 = smov [#allocation4]  }
   0x2   :  { %s22_s10 = sshll.u32 %s700_s30, 4  ;;  %s42_s12 = sshll.u32 %s701_s11, 4  ;;  %s23_s10 = int_to_ptr.vmem [resolvable:$true] %s22_s10  ;;  %s43_s12 = int_to_ptr.vmem [resolvable:$true] %s42_s12 }
   0x3   :  { %s652_s15 = scalar_lea.hbm %s875_s0, 128 }
   0x4   :  { %p653_p0 = scmp.ne.s32.totalorder %s875_s0, %s652_s15  ;;  %p656_p1 = scmp.lt.u32.totalorder %s652_s15, %s875_s0 }
   0x6   :  { %p658_p2 = pnand %p656_p1, %p653_p0 }
   0x8   :  { %661 = shalt.err (!%p658_p2)
}
   0x9   :  { %s662_s20 = scalar_lea.vmem %s23_s10, 128  ;;  %p667_p4 = scmp.lt.s32.totalorder %s23_s10, %s23_s10 }
   0xa   :  { %p663_p3 = scmp.ne.s32.totalorder %s23_s10, %s662_s20  ;;  %p668_p5 = scmp.lt.s32.totalorder %s662_s20, %s662_s20 }
   0xc   :  { %p669_p6 = por %p668_p5, %p667_p4 }
   0xe   :  { %p670_p7 = pnand %p669_p6, %p663_p3 }
  0x10   :  { %673 = shalt.err (!%p670_p7)
}
  0x11   :  { %25 = dma.hbm_to_vmem [thread:$0]  %s875_s0, 128, %s23_s10, [#allocation3]  }
  0x12   :  { %s674_s25 = scalar_lea.hbm %s881_s6, 16 }
  0x13   :  { %p675_p8 = scmp.ne.s32.totalorder %s881_s6, %s674_s25  ;;  %p678_p9 = scmp.lt.u32.totalorder %s674_s25, %s881_s6 }
  0x15   :  { %p680_p10 = pnand %p678_p9, %p675_p8 }
  0x17   :  { %683 = shalt.err (!%p680_p10)
}
  0x18   :  { %s684_s30 = scalar_lea.vmem %s43_s12, 16  ;;  %s688_s11 = scalar_lea.vmem %s43_s12, 32 }
  0x19   :  { %p685_p11 = scmp.ne.s32.totalorder %s43_s12, %s684_s30  ;;  %p689_p12 = scmp.lt.s32.totalorder %s43_s12, %s43_s12 }
  0x1a   :  { %p690_p13 = scmp.lt.s32.totalorder %s688_s11, %s684_s30 }
  0x1c   :  { %p691_p0 = por %p690_p13, %p689_p12 }
  0x1e   :  { %p692_p1 = pnand %p691_p0, %p685_p11 }
  0x20   :  { %695 = shalt.err (!%p692_p1)
}
  0x21   :  { %45 = dma.hbm_to_vmem [thread:$0]  %s881_s6, 16, %s43_s12, [#allocation5]  }
  0x22   :  { %696 = dma.done.wait [#allocation3], 128  }
  0x23   :  { %697 = vsyncadd [#allocation3], 4294967168 }
  0x24   :  { %698 = dma.done.wait [#allocation5], 16  }
  0x25   :  { %699 = vsyncadd [#allocation5], 4294967280  ;;  %v702_v0 = vmov 0.0|0.0   ;;  %vm703_vm0 = vmmov 0   ;;  %v704_v1 = vmov 0.0   ;;  %v59_v2 = vld [vmem:[%s877_s2] sm:$0xff] }
  0x26   :  { %602 = vmatprep.subr.bf16.mxu0 %v702_v0  ;;  %608 = vmatprep.subr.bf16.mxu1 %v702_v0  ;;  %v60_v3 = vld [vmem:[%s877_s2 + $0x8] sm:$0xff]  ;;  %v57_v4 = vld [vmem:[%s876_s1] sm:$0xff]  ;;  %v61_v7 = vld [vmem:[%s877_s2 + $0x10] sm:$0xff]  ;;  %vm138_vm1 = vcmask 130048   ;;  %s705_s23 = smov 64   ;;  %s706_s24 = smov 32  }
  0x27   :  { %566 = vmatprep.mubr.msk.f32.mxu1 %vm703_vm0, %v704_v1  ;;  %559 = vmatprep.mubr.msk.f32.mxu0 %vm703_vm0, %v704_v1  ;;  %v603_v5 = vpack.c.bf16 %v60_v3, %v59_v2  ;;  %v58_v6 = vld [vmem:[%s876_s1 + $0x8] sm:$0xff]  ;;  %v62_v8 = vld [vmem:[%s877_s2 + $0x18] sm:$0xff]  ;;  %v56_v11 = vld [vmem:[#allocation2] sm:$0xff]  ;;  %vm64_vm2 = vcmask 261120  }
  0x28   :  { %v609_v9 = vpack.c.bf16 %v58_v6, %v57_v4  ;;  %v606_v10 = vpack.c.bf16 %v62_v8, %v61_v7  ;;  %v522_v14 = vld [vmem:[%s878_s3] ss:$0 sm:$0xff]  ;;  %v248_v31 = vld [vmem:[%s880_s5 + $0x8] sm:$0xff]  ;;  %v249_v35 = vld [vmem:[%s880_s5 + $0x10] sm:$0xff] }
  0x29   :  { %604 = vmatpush3.bf16.msra.mxu0 %v603_v5  ;;  %v247_v30 = vld [vmem:[%s880_s5] sm:$0xff]  ;;  %v244_v34 = vld [vmem:[%s879_s4 + $0x8] sm:$0xff]  ;;  %v250_v36 = vld [vmem:[%s880_s5 + $0x18] sm:$0xff] }
  0x2a   :  { %605 = vmatprep.subr.bf16.mxu0 %v702_v0  ;;  %610 = vmatpush3.bf16.msra.mxu1 %v609_v9  ;;  %v243_v32 = vld [vmem:[%s879_s4] sm:$0xff]  ;;  %v612_v33 = vpack.c.bf16 %v248_v31, %v247_v30  ;;  %v245_v38 = vld [vmem:[%s879_s4 + $0x10] sm:$0xff]  ;;  %v246_v39 = vld [vmem:[%s879_s4 + $0x18] sm:$0xff]  ;;  %v615_v40 = vpack.c.bf16 %v250_v36, %v249_v35 }
  0x2b   :  { %611 = vmatprep.subr.bf16.mxu1 %v702_v0  ;;  %v618_v37 = vpack.c.bf16 %v244_v34, %v243_v32  ;;  %v621_v41 = vpack.c.bf16 %v246_v39, %v245_v38  ;;  %v525_v47 = vld [vmem:[#allocation4] ss:$0 sm:$0xff]  ;;  %v430_v3 = vld [vmem:[%s882_s7 + $0x10] sm:$0xff]  ;;  %v431_v5 = vld [vmem:[%s882_s7 + $0x18] sm:$0xff] }
  0x2c   :  { %v429_v2 = vld [vmem:[%s882_s7 + $0x8] sm:$0xff]  ;;  %v627_v6 = vpack.c.bf16 %v431_v5, %v430_v3 }
  0x2d   :  { %607 = vmatpush3.bf16.msra.mxu0 %v606_v10  ;;  %567 = vmatmul.mubr.msk.f32.vlgmr.msra.gmra.mrb[0].mxu1 %vm138_vm1, %v56_v11  ;;  %v526_v11 = vld [vmem:[%s883_s8] ss:$0 sm:$0xff] }
  0x2e   :  { %617 = vmatprep.subr.bf16.mxu0 %v702_v0  ;;  %577 = vmatprep.mubr.msk.f32.mxu1 %vm703_vm0, %v704_v1 }
  0x2f   :  { %613 = vmatpush3.bf16.msra.mxu1 %v612_v33 }
  0x30   :  { %560 = vmatmul.mubr.f32.vlgmr.msra.gmra.mrb[0].mxu0 %v704_v1  ;;  %614 = vmatprep.subr.bf16.mxu1 %v702_v0 }
  0x31   :  { %588 = vmatprep.mubr.msk.f32.mxu0 %vm703_vm0, %v704_v1  ;;  %619 = vmatpush3.bf16.msra.mxu0 %v618_v37 }
  0x32   :  { %620 = vmatprep.subr.bf16.mxu0 %v702_v0 }
  0x33   :  { %616 = vmatpush3.bf16.msra.mxu1 %v615_v40 }
  0x34   :  { %623 = vmatprep.subr.bf16.mxu1 %v702_v0 }
  0x35   :  { %622 = vmatpush3.bf16.msra.mxu0 %v621_v41 }
 0x100   :  { %v208_v12 = vpop.f32.mrb[0].mxu1 }
 0x101   :  { %v568_v13 = vpop.f32.mrb[1].mxu1 }
 0x103   :  { %v134_v15 = vpop.f32.mrb[0].mxu0 }
 0x104   :  { %v209_v16 = vadd.f32 %v208_v12, %v134_v15  ;;  %v561_v17 = vpop.f32.mrb[1].mxu0 }
 0x106   :  { %v218_v18 = vadd.f32 %v522_v14, %v209_v16 }
 0x108   :  { %636 = vtanh.f32 %v218_v18  ;;  %v219_v20 = vsub.f32 0.0, %v218_v18 }
 0x10a   :  { %v220_v21 = vmul.f32 1.442695, %v219_v20 }
 0x10c   :  { %638 = vpow2.f32 %v220_v21 }
 0x112   :  { %v637_v19 = vpop.eup %636 }
 0x113   :  { %228 = vrot.lane.b32.xlu0 %v637_v19, %s705_s23 }
 0x116   :  { %v639_v22 = vpop.eup %638 }
 0x117   :  { %v222_v23 = vadd.f32 1.0, %v639_v22 }
 0x119   :  { %640 = vrcp.f32 %v222_v23 }
 0x123   :  { %v641_v24 = vpop.eup %640 }
 0x124   :  { %v226_v27 = vmul.f32 0.0, %v641_v24 }
 0x185   :  { %v229_v25 = vpop.permute.xlu0 %228 }
 0x186   :  { %v231_v26 = vmul.f32 %v641_v24, %v229_v25 }
 0x188   :  { %233 = vrot.lane.b32.xlu0 %v231_v26, %s706_s24 }
 0x1fa   :  { %v234_v28 = vpop.permute.xlu0 %233 }
 0x1fb   :  { %v236_v29 = vadd.f32 %v234_v28, %v226_v27 }
 0x1fd   :  { %642 = vtanh.f32 %v236_v29 }
 0x207   :  { %v643_v42 = vpop.eup %642 }
 0x208   :  { %239 = vrot.lane.b32.xlu1 %v643_v42, %s705_s23 }
 0x27a   :  { %v240_v43 = vpop.permute.xlu1 %239 }
 0x27b   :  { %v242_v44 = vmul.f32 %v641_v24, %v240_v43 }
 0x27d   :  { %253 = vrot.lane.b32.xlu1 %v242_v44, %s706_s24 }
 0x2ef   :  { %v254_v45 = vpop.permute.xlu1 %253 }
 0x2f0   :  { %578 = vmatmul.mubr.msk.f32.vlgmr.msra.gmra.mrb[2].mxu1 %vm64_vm2, %v254_v45  ;;  %589 = vmatmul.mubr.msk.f32.vlgmr.msra.gmra.mrb[2].mxu0 %vm64_vm2, %v254_v45 }
 0x2f1   :  { %599 = vmatprep.mubr.msk.f32.mxu1 %vm703_vm0, %v704_v1  ;;  %v428_v1 = vld [vmem:[%s882_s7] sm:$0xff] }
 0x2f2   :  { %v624_v4 = vpack.c.bf16 %v429_v2, %v428_v1 }
 0x2f4   :  { %625 = vmatpush3.bf16.msra.mxu1 %v624_v4 }
 0x2f5   :  { %626 = vmatprep.subr.bf16.mxu1 %v702_v0 }
 0x2f8   :  { %628 = vmatpush3.bf16.msra.mxu1 %v627_v6 }
 0x3c3   :  { %v323_v46 = vpop.f32.mrb[2].mxu1  ;;  %v393_v48 = vpop.f32.mrb[2].mxu0 }
 0x3c4   :  { %v394_v49 = vadd.f32 %v393_v48, %v323_v46  ;;  %v579_v50 = vpop.f32.mrb[3].mxu1  ;;  %v590_v51 = vpop.f32.mrb[3].mxu0 }
 0x3c6   :  { %v403_v52 = vadd.f32 %v525_v47, %v394_v49 }
 0x3c8   :  { %644 = vtanh.f32 %v403_v52  ;;  %v404_v54 = vsub.f32 0.0, %v403_v52 }
 0x3ca   :  { %v405_v55 = vmul.f32 1.442695, %v404_v54 }
 0x3cc   :  { %646 = vpow2.f32 %v405_v55 }
 0x3d2   :  { %v645_v53 = vpop.eup %644 }
 0x3d3   :  { %413 = vrot.lane.b32.xlu0 %v645_v53, %s705_s23 }
 0x3d6   :  { %v647_v56 = vpop.eup %646 }
 0x3d7   :  { %v407_v57 = vadd.f32 1.0, %v647_v56 }
 0x3d9   :  { %648 = vrcp.f32 %v407_v57 }
 0x3e3   :  { %v649_v58 = vpop.eup %648 }
 0x3e4   :  { %v411_v61 = vmul.f32 %v649_v58, %v236_v29 }
 0x445   :  { %v414_v59 = vpop.permute.xlu0 %413 }
 0x446   :  { %v416_v60 = vmul.f32 %v649_v58, %v414_v59 }
 0x448   :  { %418 = vrot.lane.b32.xlu1 %v416_v60, %s706_s24 }
 0x4ba   :  { %v419_v62 = vpop.permute.xlu1 %418 }
 0x4bb   :  { %v421_v63 = vadd.f32 %v419_v62, %v411_v61 }
 0x4bd   :  { %650 = vtanh.f32 %v421_v63 }
 0x4c7   :  { %v651_v7 = vpop.eup %650 }
 0x4c8   :  { %424 = vrot.lane.b32.xlu0 %v651_v7, %s705_s23 }
 0x53a   :  { %v425_v8 = vpop.permute.xlu0 %424 }
 0x53b   :  { %v427_v9 = vmul.f32 %v649_v58, %v425_v8 }
 0x53d   :  { %440 = vrot.lane.b32.xlu1 %v427_v9, %s706_s24 }
 0x5af   :  { %v441_v10 = vpop.permute.xlu1 %440 }
 0x5b0   :  { %600 = vmatmul.mubr.msk.f32.vlgmr.msra.gmra.mrb[4].mxu1 %vm64_vm2, %v441_v10 }
 0x683   :  { %v510_v12 = vpop.f32.mrb[4].mxu1 }
 0x684   :  { %v511_v13 = vadd.f32 %v526_v11, %v510_v12  ;;  %v601_v14 = vpop.f32.mrb[5].mxu1 }
 0x686   :  { %514 = vst [vmem:[%s884_s9] sm:$0xff] %v511_v13 }
 0x687   :  { %519 = vsyncpa [#allocation3], 1 }
 0x688   :  { %520 = vsyncpa [#allocation5], 1 }

</bundles_post_ra>
